<compile_context>
chip_gen: v6e
topology: v6e:2x2x1
jax: 0.10.0
libtpu: 0.0.40
codegen_flags: <defaults>
</compile_context>

<pallas_src>
import functools

import jax
import jax.numpy as jnp
from jax.experimental import pallas as pl
from jax.experimental.pallas import tpu as pltpu


def _round_up(x, m):
    return ((x + m - 1) // m) * m


# ---------------------------------------------------------------------------
# Kernel
# ---------------------------------------------------------------------------
def _duel_kernel(x_ref,
                 w1_ref, b1_ref, w2_ref, b2_ref,      # shared trunk (net__state)
                 wh1_ref, bh1_ref,                    # fused head layer 1: [wv1 | wa1]
                 wh2_ref, bh2_ref,                    # fused head layer 2: block-diag, lane-padded
                 out_ref,
                 *, action_dim, use_bf16):
    if use_bf16:
        act = lambda t: t.astype(jnp.bfloat16)        # MXU inputs only; accumulation stays f32
    else:
        act = lambda t: t

    x = x_ref[...]

    # --- shared trunk: Linear -> ReLU -> Linear -> ReLU ---
    h = jnp.dot(act(x), w1_ref[...], preferred_element_type=jnp.float32) + b1_ref[...]
    h = jnp.maximum(h, 0.0)
    h = jnp.dot(act(h), w2_ref[...], preferred_element_type=jnp.float32) + b2_ref[...]
    h = jnp.maximum(h, 0.0)

    # --- fused heads, layer 1: (B, 2*mid) = [value_hidden | adv_hidden] ---
    g = jnp.dot(act(h), wh1_ref[...], preferred_element_type=jnp.float32) + bh1_ref[...]
    g = jnp.maximum(g, 0.0)

    # --- fused heads, layer 2 (lane-dense, block-diagonal):
    #     y[:, 0:A] = advantage, y[:, A:-1] = exact zeros, y[:, -1] = value
    y = jnp.dot(act(g), wh2_ref[...], preferred_element_type=jnp.float32) + bh2_ref[...]

    out_pad = y.shape[1]
    v = y[:, out_pad - 1:out_pad]                      # (B, 1) value
    total = jnp.sum(y, axis=1, keepdims=True)          # sum(adv) + value  (padding == 0)
    a_mean = (total - v) * (1.0 / float(action_dim))   # mean over the A advantage columns

    # q = value + adv - mean(adv); write only the useful A columns (narrow output).
    out_ref[...] = (y[:, :action_dim] + v - a_mean).astype(out_ref.dtype)


# ---------------------------------------------------------------------------
# Wrapper
# ---------------------------------------------------------------------------
_SINGLE_BUFFER_OK = True  # flipped to False if this JAX build rejects pl.Buffered(1)


def _choose_batch_tile(B, state_dim, mid_dim, out_pad, action_dim, weight_bytes, batch_tile):
    """Batch tile: big enough to amortize ~0.35us/step pipeline overhead, small enough
    for a conservative VMEM budget, and giving >=2 grid steps for large B (v7x dual-TC)."""
    if batch_tile is None:
        budget = 40 * 1024 * 1024                      # conservative for v7x (64 MiB physical)
        # approx f32 bytes of live per-row activations + double-buffered in/out blocks
        per_row = 4 * (2 * state_dim + 3 * mid_dim + 2 * mid_dim + out_pad + 2 * action_dim)
        avail = max(budget - 2 * weight_bytes, 4 * 1024 * 1024)
        batch_tile = min(2048, max(8, avail // max(per_row, 1)))
    batch_tile = max(8, (int(batch_tile) // 8) * 8)    # sublane rule (robust to odd user values)
    # Prefer >=2 grid steps so dimension_semantics=("parallel",) shards across v7x TCs.
    desired = min(batch_tile, _round_up(pl.cdiv(B, 2), 8))
    if desired >= B:
        return B                                       # single step; block dim == full array dim
    return desired


def _vmem_limit(weight_bytes, tile_b, state_dim, mid_dim, out_pad, action_dim):
    per_row = 4 * (2 * state_dim + 3 * mid_dim + 2 * mid_dim + out_pad + 2 * action_dim)
    need = 2 * weight_bytes + tile_b * per_row + (8 << 20)
    return int(min(64 << 20, max(32 << 20, need)))


def _build_call(weight_args, B, tile_b, state_dim, action_dim,
                use_bf16, single_buffer_weights, vmem_limit):
    def w_spec(shape):
        if single_buffer_weights:
            # Constant-index weights: no need to double-buffer them.
            return pl.BlockSpec(shape, lambda i: (0, 0), pipeline_mode=pl.Buffered(1))
        return pl.BlockSpec(shape, lambda i: (0, 0))

    in_specs = [pl.BlockSpec((tile_b, state_dim), lambda i: (i, 0))]
    in_specs += [w_spec(w.shape) for w in weight_args]

    return pl.pallas_call(
        functools.partial(_duel_kernel, action_dim=action_dim, use_bf16=use_bf16),
        out_shape=jax.ShapeDtypeStruct((B, action_dim), jnp.float32),
        grid=(pl.cdiv(B, tile_b),),
        in_specs=in_specs,
        out_specs=pl.BlockSpec((tile_b, action_dim), lambda i: (i, 0)),
        compiler_params=pltpu.CompilerParams(
            dimension_semantics=("parallel",),
            vmem_limit_bytes=vmem_limit),
    )


def qnet_duel_forward(state, packed, action_dim, *, batch_tile=None, use_bf16=False):
    """state: (B, state_dim) float32.  packed: dict from pack_params()."""
    global _SINGLE_BUFFER_OK
    B, state_dim = state.shape
    out_pad = packed["wh2"].shape[1]
    mid_dim = packed["w2"].shape[1]

    weight_args = (packed["w1"], packed["b1"], packed["w2"], packed["b2"],
                   packed["wh1"], packed["bh1"], packed["wh2"], packed["bh2"])
    weight_bytes = sum(int(w.size) * w.dtype.itemsize for w in weight_args)

    tile_b = _choose_batch_tile(B, state_dim, mid_dim, out_pad, action_dim,
                                weight_bytes, batch_tile)
    vmem_limit = _vmem_limit(weight_bytes, tile_b, state_dim, mid_dim, out_pad, action_dim)

    if _SINGLE_BUFFER_OK:
        try:
            call = _build_call(weight_args, B, tile_b, state_dim, action_dim,
                               use_bf16, True, vmem_limit)
            return call(state, *weight_args)
        except Exception:
            _SINGLE_BUFFER_OK = False  # this build doesn't take Buffered(1); use defaults
    call = _build_call(weight_args, B, tile_b, state_dim, action_dim,
                       use_bf16, False, vmem_limit)
    return call(state, *weight_args)


# ---------------------------------------------------------------------------
# Parameter construction / packing / reference
# ---------------------------------------------------------------------------
def init_params(key, state_dim, mid_dim, action_dim):
    """Deterministic synthetic init. Weights stored as (in_features, out_features)."""
    def linear(k, fan_in, fan_out):
        kw, kb = jax.random.split(k)
        bound = 1.0 / jnp.sqrt(fan_in)
        w = jax.random.uniform(kw, (fan_in, fan_out), jnp.float32, -bound, bound)
        b = jax.random.uniform(kb, (1, fan_out), jnp.float32, -bound, bound)
        return w, b

    ks = jax.random.split(key, 6)
    p = {}
    p["w1"], p["b1"] = linear(ks[0], state_dim, mid_dim)
    p["w2"], p["b2"] = linear(ks[1], mid_dim, mid_dim)
    p["wv1"], p["bv1"] = linear(ks[2], mid_dim, mid_dim)
    p["wv2"], p["bv2"] = linear(ks[3], mid_dim, 1)
    p["wa1"], p["ba1"] = linear(ks[4], mid_dim, mid_dim)
    p["wa2"], p["ba2"] = linear(ks[5], mid_dim, action_dim)
    return p


def pack_params(p, action_dim, *, use_bf16=False):
    """Fuse value/advantage heads into two wide, lane-dense matmuls.
    If use_bf16, weights are stored bf16 (halves weight DMA/VMEM); biases stay f32.
    Padding columns stay exactly zero (required for the sum-based dueling mean)."""
    mid = p["w2"].shape[1]
    out_pad = _round_up(action_dim + 1, 128)
    wdt = jnp.bfloat16 if use_bf16 else jnp.float32

    # Head layer 1: concat -> (mid, 2*mid) weight, (1, 2*mid) bias.
    wh1 = jnp.concatenate([p["wv1"], p["wa1"]], axis=1)
    bh1 = jnp.concatenate([p["bv1"], p["ba1"]], axis=1)

    # Head layer 2: block-diagonal, padded to 128 lanes.
    wh2 = jnp.zeros((2 * mid, out_pad), jnp.float32)
    wh2 = wh2.at[mid:, :action_dim].set(p["wa2"])
    wh2 = wh2.at[:mid, out_pad - 1:].set(p["wv2"])
    bh2 = jnp.zeros((1, out_pad), jnp.float32)
    bh2 = bh2.at[:, :action_dim].set(p["ba2"][0])
    bh2 = bh2.at[:, out_pad - 1].set(p["bv2"][0, 0])

    return {"w1": p["w1"].astype(wdt), "b1": p["b1"],
            "w2": p["w2"].astype(wdt), "b2": p["b2"],
            "wh1": wh1.astype(wdt), "bh1": bh1,
            "wh2": wh2.astype(wdt), "bh2": bh2}


def reference_forward(state, p):
    """Pure-JAX reference mirroring the PyTorch forward (unfused params)."""
    h = jnp.maximum(state @ p["w1"] + p["b1"], 0.0)
    h = jnp.maximum(h @ p["w2"] + p["b2"], 0.0)
    v = jnp.maximum(h @ p["wv1"] + p["bv1"], 0.0) @ p["wv2"] + p["bv2"]
    a = jnp.maximum(h @ p["wa1"] + p["ba1"], 0.0) @ p["wa2"] + p["ba2"]
    return v + a - a.mean(axis=1, keepdims=True)


if __name__ == "__main__":
    key = jax.random.PRNGKey(0)
    k_params, k_state, k_state2 = jax.random.split(key, 3)

    batch, state_dim, mid_dim, action_dim = 8, 16, 32, 4
    params = init_params(k_params, state_dim, mid_dim, action_dim)
    state = jax.random.normal(k_state, (batch, state_dim), jnp.float32)
    q_ref = reference_forward(state, params)

    # f32 path: exact vs reference.
    packed = pack_params(params, action_dim)
    q = jax.block_until_ready(qnet_duel_forward(state, packed, action_dim))
    assert q.shape == (batch, action_dim)
    assert jnp.allclose(q, q_ref, atol=1e-4, rtol=1e-4), "f32 mismatch vs reference"

    # Non-tile-multiple batch: exercises the masked trailing partial block (no jnp.pad).
    batch2 = 13
    state2 = jax.random.normal(k_state2, (batch2, state_dim), jnp.float32)
    q2 = jax.block_until_ready(qnet_duel_forward(state2, packed, action_dim, batch_tile=8))
    q2_ref = reference_forward(state2, params)
    assert q2.shape == (batch2, action_dim)
    assert jnp.allclose(q2, q2_ref, atol=1e-4, rtol=1e-4), "partial-block mismatch vs reference"

    # bf16 weight / MXU path (looser tolerance; precision change is expected, not a bug).
    packed_bf16 = pack_params(params, action_dim, use_bf16=True)
    q3 = jax.block_until_ready(qnet_duel_forward(state, packed_bf16, action_dim, use_bf16=True))
    assert q3.shape == (batch, action_dim)
    assert jnp.allclose(q3, q_ref, atol=5e-2, rtol=5e-2), "bf16 mismatch vs reference"

    print("KERNEL_OK")
</pallas_src>

<mosaic_0001>
module attributes {stable_mosaic.version = 11 : i64} {
  func.func @_duel_kernel(%arg0: i32, %arg1: memref<8x16xf32, #tpu.memory_space<vmem>>, %arg2: memref<16x32xf32, #tpu.memory_space<vmem>>, %arg3: memref<1x32xf32, #tpu.memory_space<vmem>>, %arg4: memref<32x32xf32, #tpu.memory_space<vmem>>, %arg5: memref<1x32xf32, #tpu.memory_space<vmem>>, %arg6: memref<32x64xf32, #tpu.memory_space<vmem>>, %arg7: memref<1x64xf32, #tpu.memory_space<vmem>>, %arg8: memref<64x128xf32, #tpu.memory_space<vmem>>, %arg9: memref<1x128xf32, #tpu.memory_space<vmem>>, %arg10: memref<8x4xf32, #tpu.memory_space<vmem>>) attributes {dimension_semantics = [#tpu.dimension_semantics<parallel>], iteration_bounds = array<i64: 1>, scalar_prefetch = 0 : i64, scratch_operands = 0 : i64, tpu.core_type = #tpu.core_type<tc>, window_params = [{transform_indices = @transform_0, window_bounds = array<i64: 8, 16>}, {pipeline_mode = #tpu.pipeline_mode<synchronous>, transform_indices = @transform_1, window_bounds = array<i64: 16, 32>}, {pipeline_mode = #tpu.pipeline_mode<synchronous>, transform_indices = @transform_2, window_bounds = array<i64: 1, 32>}, {pipeline_mode = #tpu.pipeline_mode<synchronous>, transform_indices = @transform_3, window_bounds = array<i64: 32, 32>}, {pipeline_mode = #tpu.pipeline_mode<synchronous>, transform_indices = @transform_4, window_bounds = array<i64: 1, 32>}, {pipeline_mode = #tpu.pipeline_mode<synchronous>, transform_indices = @transform_5, window_bounds = array<i64: 32, 64>}, {pipeline_mode = #tpu.pipeline_mode<synchronous>, transform_indices = @transform_6, window_bounds = array<i64: 1, 64>}, {pipeline_mode = #tpu.pipeline_mode<synchronous>, transform_indices = @transform_7, window_bounds = array<i64: 64, 128>}, {pipeline_mode = #tpu.pipeline_mode<synchronous>, transform_indices = @transform_8, window_bounds = array<i64: 1, 128>}, {transform_indices = @transform_9, window_bounds = array<i64: 8, 4>}]} {
    %c0 = arith.constant 0 : index
    %c0_0 = arith.constant 0 : index
    %0 = vector.load %arg1[%c0, %c0_0] : memref<8x16xf32, #tpu.memory_space<vmem>>, vector<8x16xf32>
    %c0_1 = arith.constant 0 : index
    %c0_2 = arith.constant 0 : index
    %1 = vector.load %arg2[%c0_1, %c0_2] : memref<16x32xf32, #tpu.memory_space<vmem>>, vector<16x32xf32>
    %cst = arith.constant dense<0.000000e+00> : vector<8x32xf32>
    %2 = tpu.matmul %0, %1, %cst {dimension_numbers = #tpu.dot_dimension_numbers<[1], [0], [0], [1], [0, 0, 1, 1], [], []>} : vector<8x16xf32>, vector<16x32xf32>, vector<8x32xf32> -> vector<8x32xf32>
    %c0_3 = arith.constant 0 : index
    %c0_4 = arith.constant 0 : index
    %3 = vector.load %arg3[%c0_3, %c0_4] : memref<1x32xf32, #tpu.memory_space<vmem>>, vector<1x32xf32>
    %4 = vector.broadcast %3 : vector<1x32xf32> to vector<8x32xf32>
    %5 = arith.addf %2, %4 : vector<8x32xf32>
    %cst_5 = arith.constant 0.000000e+00 : f32
    %6 = vector.broadcast %cst_5 : f32 to vector<8x32xf32>
    %7 = arith.maximumf %5, %6 : vector<8x32xf32>
    %c0_6 = arith.constant 0 : index
    %c0_7 = arith.constant 0 : index
    %8 = vector.load %arg4[%c0_6, %c0_7] : memref<32x32xf32, #tpu.memory_space<vmem>>, vector<32x32xf32>
    %cst_8 = arith.constant dense<0.000000e+00> : vector<8x32xf32>
    %9 = tpu.matmul %7, %8, %cst_8 {dimension_numbers = #tpu.dot_dimension_numbers<[1], [0], [0], [1], [0, 0, 1, 1], [], []>} : vector<8x32xf32>, vector<32x32xf32>, vector<8x32xf32> -> vector<8x32xf32>
    %c0_9 = arith.constant 0 : index
    %c0_10 = arith.constant 0 : index
    %10 = vector.load %arg5[%c0_9, %c0_10] : memref<1x32xf32, #tpu.memory_space<vmem>>, vector<1x32xf32>
    %11 = vector.broadcast %10 : vector<1x32xf32> to vector<8x32xf32>
    %12 = arith.addf %9, %11 : vector<8x32xf32>
    %cst_11 = arith.constant 0.000000e+00 : f32
    %13 = vector.broadcast %cst_11 : f32 to vector<8x32xf32>
    %14 = arith.maximumf %12, %13 : vector<8x32xf32>
    %c0_12 = arith.constant 0 : index
    %c0_13 = arith.constant 0 : index
    %15 = vector.load %arg6[%c0_12, %c0_13] : memref<32x64xf32, #tpu.memory_space<vmem>>, vector<32x64xf32>
    %cst_14 = arith.constant dense<0.000000e+00> : vector<8x64xf32>
    %16 = tpu.matmul %14, %15, %cst_14 {dimension_numbers = #tpu.dot_dimension_numbers<[1], [0], [0], [1], [0, 0, 1, 1], [], []>} : vector<8x32xf32>, vector<32x64xf32>, vector<8x64xf32> -> vector<8x64xf32>
    %c0_15 = arith.constant 0 : index
    %c0_16 = arith.constant 0 : index
    %17 = vector.load %arg7[%c0_15, %c0_16] : memref<1x64xf32, #tpu.memory_space<vmem>>, vector<1x64xf32>
    %18 = vector.broadcast %17 : vector<1x64xf32> to vector<8x64xf32>
    %19 = arith.addf %16, %18 : vector<8x64xf32>
    %cst_17 = arith.constant 0.000000e+00 : f32
    %20 = vector.broadcast %cst_17 : f32 to vector<8x64xf32>
    %21 = arith.maximumf %19, %20 : vector<8x64xf32>
    %c0_18 = arith.constant 0 : index
    %c0_19 = arith.constant 0 : index
    %22 = vector.load %arg8[%c0_18, %c0_19] : memref<64x128xf32, #tpu.memory_space<vmem>>, vector<64x128xf32>
    %cst_20 = arith.constant dense<0.000000e+00> : vector<8x128xf32>
    %23 = tpu.matmul %21, %22, %cst_20 {dimension_numbers = #tpu.dot_dimension_numbers<[1], [0], [0], [1], [0, 0, 1, 1], [], []>} : vector<8x64xf32>, vector<64x128xf32>, vector<8x128xf32> -> vector<8x128xf32>
    %c0_21 = arith.constant 0 : index
    %c0_22 = arith.constant 0 : index
    %24 = vector.load %arg9[%c0_21, %c0_22] : memref<1x128xf32, #tpu.memory_space<vmem>>, vector<1x128xf32>
    %25 = vector.broadcast %24 : vector<1x128xf32> to vector<8x128xf32>
    %26 = arith.addf %23, %25 : vector<8x128xf32>
    %27 = vector.extract_strided_slice %26 {offsets = [0, 127], sizes = [8, 1], strides = [1, 1]} : vector<8x128xf32> to vector<8x1xf32>
    %cst_23 = arith.constant dense<0.000000e+00> : vector<8xf32>
    %28 = vector.multi_reduction <add>, %26, %cst_23 [1] : vector<8x128xf32> to vector<8xf32>
    %29 = vector.shape_cast %28 : vector<8xf32> to vector<8x1xf32>
    %30 = arith.subf %29, %27 : vector<8x1xf32>
    %cst_24 = arith.constant 2.500000e-01 : f32
    %31 = vector.broadcast %cst_24 : f32 to vector<8x1xf32>
    %32 = arith.mulf %30, %31 : vector<8x1xf32>
    %33 = vector.extract_strided_slice %26 {offsets = [0, 0], sizes = [8, 4], strides = [1, 1]} : vector<8x128xf32> to vector<8x4xf32>
    %34 = vector.broadcast %27 : vector<8x1xf32> to vector<8x4xf32>
    %35 = arith.addf %33, %34 : vector<8x4xf32>
    %36 = vector.broadcast %32 : vector<8x1xf32> to vector<8x4xf32>
    %37 = arith.subf %35, %36 : vector<8x4xf32>
    %c0_25 = arith.constant 0 : index
    %c0_26 = arith.constant 0 : index
    %38 = vector.load %arg10[%c0_25, %c0_26] : memref<8x4xf32, #tpu.memory_space<vmem>>, vector<8x4xf32>
    tpu.vector_store %arg10[%c0_25, %c0_26], %37 {strides = array<i32>} : memref<8x4xf32, #tpu.memory_space<vmem>>, vector<8x4xf32>,
    return
  }
  func.func @transform_0(%arg0: i32) -> (i32, i32) {
    %c0_i32 = arith.constant 0 : i32
    %c0_i32_0 = arith.constant 0 : i32
    return %arg0, %c0_i32 : i32, i32
  }
  func.func @transform_1(%arg0: i32) -> (i32, i32) {
    %c0_i32 = arith.constant 0 : i32
    %c0_i32_0 = arith.constant 0 : i32
    %c0_i32_1 = arith.constant 0 : i32
    return %c0_i32, %c0_i32_0 : i32, i32
  }
  func.func @transform_2(%arg0: i32) -> (i32, i32) {
    %c0_i32 = arith.constant 0 : i32
    %c0_i32_0 = arith.constant 0 : i32
    %c0_i32_1 = arith.constant 0 : i32
    return %c0_i32, %c0_i32_0 : i32, i32
  }
  func.func @transform_3(%arg0: i32) -> (i32, i32) {
    %c0_i32 = arith.constant 0 : i32
    %c0_i32_0 = arith.constant 0 : i32
    %c0_i32_1 = arith.constant 0 : i32
    return %c0_i32, %c0_i32_0 : i32, i32
  }
  func.func @transform_4(%arg0: i32) -> (i32, i32) {
    %c0_i32 = arith.constant 0 : i32
    %c0_i32_0 = arith.constant 0 : i32
    %c0_i32_1 = arith.constant 0 : i32
    return %c0_i32, %c0_i32_0 : i32, i32
  }
  func.func @transform_5(%arg0: i32) -> (i32, i32) {
    %c0_i32 = arith.constant 0 : i32
    %c0_i32_0 = arith.constant 0 : i32
    %c0_i32_1 = arith.constant 0 : i32
    return %c0_i32, %c0_i32_0 : i32, i32
  }
  func.func @transform_6(%arg0: i32) -> (i32, i32) {
    %c0_i32 = arith.constant 0 : i32
    %c0_i32_0 = arith.constant 0 : i32
    %c0_i32_1 = arith.constant 0 : i32
    return %c0_i32, %c0_i32_0 : i32, i32
  }
  func.func @transform_7(%arg0: i32) -> (i32, i32) {
    %c0_i32 = arith.constant 0 : i32
    %c0_i32_0 = arith.constant 0 : i32
    %c0_i32_1 = arith.constant 0 : i32
    return %c0_i32, %c0_i32_0 : i32, i32
  }
  func.func @transform_8(%arg0: i32) -> (i32, i32) {
    %c0_i32 = arith.constant 0 : i32
    %c0_i32_0 = arith.constant 0 : i32
    %c0_i32_1 = arith.constant 0 : i32
    return %c0_i32, %c0_i32_0 : i32, i32
  }
  func.func @transform_9(%arg0: i32) -> (i32, i32) {
    %c0_i32 = arith.constant 0 : i32
    %c0_i32_0 = arith.constant 0 : i32
    return %arg0, %c0_i32 : i32, i32
  }
}

module attributes {stable_mosaic.version = 11 : i64} {
  func.func @_duel_kernel(%arg0: i32, %arg1: memref<8x16xf32, #tpu.memory_space<vmem>>, %arg2: memref<16x32xf32, #tpu.memory_space<vmem>>, %arg3: memref<1x32xf32, #tpu.memory_space<vmem>>, %arg4: memref<32x32xf32, #tpu.memory_space<vmem>>, %arg5: memref<1x32xf32, #tpu.memory_space<vmem>>, %arg6: memref<32x64xf32, #tpu.memory_space<vmem>>, %arg7: memref<1x64xf32, #tpu.memory_space<vmem>>, %arg8: memref<64x128xf32, #tpu.memory_space<vmem>>, %arg9: memref<1x128xf32, #tpu.memory_space<vmem>>, %arg10: memref<8x4xf32, #tpu.memory_space<vmem>>) attributes {dimension_semantics = [#tpu.dimension_semantics<parallel>], iteration_bounds = array<i64: 1>, scalar_prefetch = 0 : i64, scratch_operands = 0 : i64, tpu.core_type = #tpu.core_type<tc>, window_params = [{transform_indices = @transform_0, window_bounds = array<i64: 8, 16>}, {pipeline_mode = #tpu.pipeline_mode<synchronous>, transform_indices = @transform_1, window_bounds = array<i64: 16, 32>}, {pipeline_mode = #tpu.pipeline_mode<synchronous>, transform_indices = @transform_2, window_bounds = array<i64: 1, 32>}, {pipeline_mode = #tpu.pipeline_mode<synchronous>, transform_indices = @transform_3, window_bounds = array<i64: 32, 32>}, {pipeline_mode = #tpu.pipeline_mode<synchronous>, transform_indices = @transform_4, window_bounds = array<i64: 1, 32>}, {pipeline_mode = #tpu.pipeline_mode<synchronous>, transform_indices = @transform_5, window_bounds = array<i64: 32, 64>}, {pipeline_mode = #tpu.pipeline_mode<synchronous>, transform_indices = @transform_6, window_bounds = array<i64: 1, 64>}, {pipeline_mode = #tpu.pipeline_mode<synchronous>, transform_indices = @transform_7, window_bounds = array<i64: 64, 128>}, {pipeline_mode = #tpu.pipeline_mode<synchronous>, transform_indices = @transform_8, window_bounds = array<i64: 1, 128>}, {transform_indices = @transform_9, window_bounds = array<i64: 8, 4>}]} {
    %c0 = arith.constant 0 : index
    %c0_0 = arith.constant 0 : index
    %0 = vector.load %arg1[%c0, %c0_0] : memref<8x16xf32, #tpu.memory_space<vmem>>, vector<8x16xf32>
    %c0_1 = arith.constant 0 : index
    %c0_2 = arith.constant 0 : index
    %1 = vector.load %arg2[%c0_1, %c0_2] : memref<16x32xf32, #tpu.memory_space<vmem>>, vector<16x32xf32>
    %cst = arith.constant dense<0.000000e+00> : vector<8x32xf32>
    %2 = tpu.matmul %0, %1, %cst {dimension_numbers = #tpu.dot_dimension_numbers<[1], [0], [0], [1], [0, 0, 1, 1], [], []>} : vector<8x16xf32>, vector<16x32xf32>, vector<8x32xf32> -> vector<8x32xf32>
    %c0_3 = arith.constant 0 : index
    %c0_4 = arith.constant 0 : index
    %3 = vector.load %arg3[%c0_3, %c0_4] : memref<1x32xf32, #tpu.memory_space<vmem>>, vector<1x32xf32>
    %4 = vector.broadcast %3 : vector<1x32xf32> to vector<8x32xf32>
    %5 = arith.addf %2, %4 : vector<8x32xf32>
    %cst_5 = arith.constant 0.000000e+00 : f32
    %6 = vector.broadcast %cst_5 : f32 to vector<8x32xf32>
    %7 = arith.maximumf %5, %6 : vector<8x32xf32>
    %c0_6 = arith.constant 0 : index
    %c0_7 = arith.constant 0 : index
    %8 = vector.load %arg4[%c0_6, %c0_7] : memref<32x32xf32, #tpu.memory_space<vmem>>, vector<32x32xf32>
    %cst_8 = arith.constant dense<0.000000e+00> : vector<8x32xf32>
    %9 = tpu.matmul %7, %8, %cst_8 {dimension_numbers = #tpu.dot_dimension_numbers<[1], [0], [0], [1], [0, 0, 1, 1], [], []>} : vector<8x32xf32>, vector<32x32xf32>, vector<8x32xf32> -> vector<8x32xf32>
    %c0_9 = arith.constant 0 : index
    %c0_10 = arith.constant 0 : index
    %10 = vector.load %arg5[%c0_9, %c0_10] : memref<1x32xf32, #tpu.memory_space<vmem>>, vector<1x32xf32>
    %11 = vector.broadcast %10 : vector<1x32xf32> to vector<8x32xf32>
    %12 = arith.addf %9, %11 : vector<8x32xf32>
    %cst_11 = arith.constant 0.000000e+00 : f32
    %13 = vector.broadcast %cst_11 : f32 to vector<8x32xf32>
    %14 = arith.maximumf %12, %13 : vector<8x32xf32>
    %c0_12 = arith.constant 0 : index
    %c0_13 = arith.constant 0 : index
    %15 = vector.load %arg6[%c0_12, %c0_13] : memref<32x64xf32, #tpu.memory_space<vmem>>, vector<32x64xf32>
    %cst_14 = arith.constant dense<0.000000e+00> : vector<8x64xf32>
    %16 = tpu.matmul %14, %15, %cst_14 {dimension_numbers = #tpu.dot_dimension_numbers<[1], [0], [0], [1], [0, 0, 1, 1], [], []>} : vector<8x32xf32>, vector<32x64xf32>, vector<8x64xf32> -> vector<8x64xf32>
    %c0_15 = arith.constant 0 : index
    %c0_16 = arith.constant 0 : index
    %17 = vector.load %arg7[%c0_15, %c0_16] : memref<1x64xf32, #tpu.memory_space<vmem>>, vector<1x64xf32>
    %18 = vector.broadcast %17 : vector<1x64xf32> to vector<8x64xf32>
    %19 = arith.addf %16, %18 : vector<8x64xf32>
    %cst_17 = arith.constant 0.000000e+00 : f32
    %20 = vector.broadcast %cst_17 : f32 to vector<8x64xf32>
    %21 = arith.maximumf %19, %20 : vector<8x64xf32>
    %c0_18 = arith.constant 0 : index
    %c0_19 = arith.constant 0 : index
    %22 = vector.load %arg8[%c0_18, %c0_19] : memref<64x128xf32, #tpu.memory_space<vmem>>, vector<64x128xf32>
    %cst_20 = arith.constant dense<0.000000e+00> : vector<8x128xf32>
    %23 = tpu.matmul %21, %22, %cst_20 {dimension_numbers = #tpu.dot_dimension_numbers<[1], [0], [0], [1], [0, 0, 1, 1], [], []>} : vector<8x64xf32>, vector<64x128xf32>, vector<8x128xf32> -> vector<8x128xf32>
    %c0_21 = arith.constant 0 : index
    %c0_22 = arith.constant 0 : index
    %24 = vector.load %arg9[%c0_21, %c0_22] : memref<1x128xf32, #tpu.memory_space<vmem>>, vector<1x128xf32>
    %25 = vector.broadcast %24 : vector<1x128xf32> to vector<8x128xf32>
    %26 = arith.addf %23, %25 : vector<8x128xf32>
    %27 = vector.extract_strided_slice %26 {offsets = [0, 127], sizes = [8, 1], strides = [1, 1]} : vector<8x128xf32> to vector<8x1xf32>
    %cst_23 = arith.constant dense<0.000000e+00> : vector<8xf32>
    %28 = vector.multi_reduction <add>, %26, %cst_23 [1] : vector<8x128xf32> to vector<8xf32>
    %29 = vector.shape_cast %28 : vector<8xf32> to vector<8x1xf32>
    %30 = arith.subf %29, %27 : vector<8x1xf32>
    %cst_24 = arith.constant 2.500000e-01 : f32
    %31 = vector.broadcast %cst_24 : f32 to vector<8x1xf32>
    %32 = arith.mulf %30, %31 : vector<8x1xf32>
    %33 = vector.extract_strided_slice %26 {offsets = [0, 0], sizes = [8, 4], strides = [1, 1]} : vector<8x128xf32> to vector<8x4xf32>
    %34 = vector.broadcast %27 : vector<8x1xf32> to vector<8x4xf32>
    %35 = arith.addf %33, %34 : vector<8x4xf32>
    %36 = vector.broadcast %32 : vector<8x1xf32> to vector<8x4xf32>
    %37 = arith.subf %35, %36 : vector<8x4xf32>
    %c0_25 = arith.constant 0 : index
    %c0_26 = arith.constant 0 : index
    %38 = vector.load %arg10[%c0_25, %c0_26] : memref<8x4xf32, #tpu.memory_space<vmem>>, vector<8x4xf32>
    tpu.vector_store %arg10[%c0_25, %c0_26], %37 {strides = array<i32>} : memref<8x4xf32, #tpu.memory_space<vmem>>, vector<8x4xf32>,
    return
  }
  func.func @transform_0(%arg0: i32) -> (i32, i32) {
    %c0_i32 = arith.constant 0 : i32
    %c0_i32_0 = arith.constant 0 : i32
    return %arg0, %c0_i32 : i32, i32
  }
  func.func @transform_1(%arg0: i32) -> (i32, i32) {
    %c0_i32 = arith.constant 0 : i32
    %c0_i32_0 = arith.constant 0 : i32
    %c0_i32_1 = arith.constant 0 : i32
    return %c0_i32, %c0_i32_0 : i32, i32
  }
  func.func @transform_2(%arg0: i32) -> (i32, i32) {
    %c0_i32 = arith.constant 0 : i32
    %c0_i32_0 = arith.constant 0 : i32
    %c0_i32_1 = arith.constant 0 : i32
    return %c0_i32, %c0_i32_0 : i32, i32
  }
  func.func @transform_3(%arg0: i32) -> (i32, i32) {
    %c0_i32 = arith.constant 0 : i32
    %c0_i32_0 = arith.constant 0 : i32
    %c0_i32_1 = arith.constant 0 : i32
    return %c0_i32, %c0_i32_0 : i32, i32
  }
  func.func @transform_4(%arg0: i32) -> (i32, i32) {
    %c0_i32 = arith.constant 0 : i32
    %c0_i32_0 = arith.constant 0 : i32
    %c0_i32_1 = arith.constant 0 : i32
    return %c0_i32, %c0_i32_0 : i32, i32
  }
  func.func @transform_5(%arg0: i32) -> (i32, i32) {
    %c0_i32 = arith.constant 0 : i32
    %c0_i32_0 = arith.constant 0 : i32
    %c0_i32_1 = arith.constant 0 : i32
    return %c0_i32, %c0_i32_0 : i32, i32
  }
  func.func @transform_6(%arg0: i32) -> (i32, i32) {
    %c0_i32 = arith.constant 0 : i32
    %c0_i32_0 = arith.constant 0 : i32
    %c0_i32_1 = arith.constant 0 : i32
    return %c0_i32, %c0_i32_0 : i32, i32
  }
  func.func @transform_7(%arg0: i32) -> (i32, i32) {
    %c0_i32 = arith.constant 0 : i32
    %c0_i32_0 = arith.constant 0 : i32
    %c0_i32_1 = arith.constant 0 : i32
    return %c0_i32, %c0_i32_0 : i32, i32
  }
  func.func @transform_8(%arg0: i32) -> (i32, i32) {
    %c0_i32 = arith.constant 0 : i32
    %c0_i32_0 = arith.constant 0 : i32
    %c0_i32_1 = arith.constant 0 : i32
    return %c0_i32, %c0_i32_0 : i32, i32
  }
  func.func @transform_9(%arg0: i32) -> (i32, i32) {
    %c0_i32 = arith.constant 0 : i32
    %c0_i32_0 = arith.constant 0 : i32
    return %arg0, %c0_i32 : i32, i32
  }
}

</mosaic_0001>

<bundles_post_ra>
// kernel: tpu_custom_call.1
= control target key start
LH: loop header
LB: loop body
LE: loop exit
PB: predicated region body
PF: predicated region fallthrough
CT: control target
= control target key end

     0   :  { %14 = vsyncpa [#allocation3], 0  ;;  %s794_s0 = inlined_call_operand.hbm [shape: f32[8,16], index: 0, kind: input, shape index: {}]   ;;  %s795_s1 = inlined_call_operand.hbm [shape: f32[16,32], index: 1, kind: input, shape index: {}]   ;;  %s796_s2 = inlined_call_operand.vmem [shape: f32[1,32], index: 2, kind: input, shape index: {}]   ;;  %s797_s3 = inlined_call_operand.hbm [shape: f32[32,32], index: 3, kind: input, shape index: {}]   ;;  %s798_s4 = inlined_call_operand.vmem [shape: f32[1,32], index: 4, kind: input, shape index: {}]   ;;  %s799_s5 = inlined_call_operand.hbm [shape: f32[32,64], index: 5, kind: input, shape index: {}]   ;;  %s800_s6 = inlined_call_operand.vmem [shape: f32[1,64], index: 6, kind: input, shape index: {}]   ;;  %s801_s7 = inlined_call_operand.hbm [shape: f32[64,128], index: 7, kind: input, shape index: {}]   ;;  %s802_s8 = inlined_call_operand.vmem [shape: f32[1,128], index: 8, kind: input, shape index: {}]   ;;  %s803_s9 = inlined_call_operand.vmem [shape: f32[8,4], index: 9, kind: output, shape index: {}]  }
   0x1   :  { %15 = vsyncpa [#allocation5], 0 }
   0x2   :  { %16 = vsyncpa [#allocation8], 0  ;;  %s664_s30 = smov [#allocation4]  }
   0x3   :  { %s32_s10 = sshll.u32 %s664_s30, 4  ;;  %s33_s10 = int_to_ptr.vmem [resolvable:$true] %s32_s10 }
   0x4   :  { %s566_s11 = scalar_lea.vmem %s33_s10, 256  ;;  %p571_p1 = scmp.lt.s32.totalorder %s33_s10, %s33_s10 }
   0x5   :  { %p567_p0 = scmp.ne.s32.totalorder %s33_s10, %s566_s11  ;;  %p572_p2 = scmp.lt.s32.totalorder %s566_s11, %s566_s11 }
   0x7   :  { %p573_p3 = por %p572_p2, %p571_p1 }
   0x9   :  { %p574_p4 = pnand %p573_p3, %p567_p0 }
   0xb   :  { %577 = shalt.err (!%p574_p4)
}
   0xc   :  { %s665_s12 = smov 128   ;;  %s666_s13 = smov 8  }
   0xd   :  { %38 = dma.hbm_to_vmem [thread:$0]  %s795_s1, 256, %s33_s10, [#allocation5], %s665_s12, %s665_s12, %s666_s13  }
   0xe   :  { %s667_s16 = smov [#allocation7]   ;;  %s668_s18 = smov [#allocation2]  }
   0xf   :  { %s60_s17 = sshll.u32 %s667_s16, 4  ;;  %s23_s19 = sshll.u32 %s668_s18, 4  ;;  %s61_s17 = int_to_ptr.vmem [resolvable:$true] %s60_s17  ;;  %s24_s19 = int_to_ptr.vmem [resolvable:$true] %s23_s19 }
  0x10   :  { %s586_s20 = scalar_lea.vmem %s61_s17, 512  ;;  %p591_p6 = scmp.lt.s32.totalorder %s61_s17, %s61_s17 }
  0x11   :  { %p587_p5 = scmp.ne.s32.totalorder %s61_s17, %s586_s20  ;;  %p592_p7 = scmp.lt.s32.totalorder %s586_s20, %s586_s20 }
  0x13   :  { %p593_p8 = por %p592_p7, %p591_p6 }
  0x15   :  { %p594_p9 = pnand %p593_p8, %p587_p5 }
  0x17   :  { %597 = shalt.err (!%p594_p9)
}
  0x18   :  { %66 = dma.hbm_to_vmem [thread:$0]  %s799_s5, 512, %s61_s17, [#allocation8], %s665_s12, %s665_s12, %s666_s13  }
  0x19   :  { %s606_s1 = scalar_lea.vmem %s24_s19, 128  ;;  %p611_p11 = scmp.lt.s32.totalorder %s24_s19, %s24_s19 }
  0x1a   :  { %p607_p10 = scmp.ne.s32.totalorder %s24_s19, %s606_s1  ;;  %p612_p12 = scmp.lt.s32.totalorder %s606_s1, %s606_s1 }
  0x1c   :  { %p613_p13 = por %p612_p12, %p611_p11 }
  0x1e   :  { %p614_p0 = pnand %p613_p13, %p607_p10 }
  0x20   :  { %617 = shalt.err (!%p614_p0)
}
  0x21   :  { %26 = dma.hbm_to_vmem [thread:$0]  %s794_s0, 128, %s24_s19, [#allocation3]  }
  0x22   :  { %s669_s25 = smov [#allocation6]   ;;  %s670_s27 = smov [#allocation9]  }
  0x23   :  { %s46_s26 = sshll.u32 %s669_s25, 4  ;;  %s74_s28 = sshll.u32 %s670_s27, 4  ;;  %s47_s26 = int_to_ptr.vmem [resolvable:$true] %s46_s26  ;;  %s75_s28 = int_to_ptr.vmem [resolvable:$true] %s74_s28 }
  0x24   :  { %s626_s29 = scalar_lea.vmem %s47_s26, 512  ;;  %p631_p2 = scmp.lt.s32.totalorder %s47_s26, %s47_s26 }
  0x25   :  { %p627_p1 = scmp.ne.s32.totalorder %s47_s26, %s626_s29  ;;  %p632_p3 = scmp.lt.s32.totalorder %s626_s29, %s626_s29 }
  0x27   :  { %p633_p4 = por %p632_p3, %p631_p2 }
  0x29   :  { %p634_p5 = pnand %p633_p4, %p627_p1 }
  0x2b   :  { %637 = shalt.err (!%p634_p5)
}
  0x2c   :  { %52 = dma.hbm_to_vmem [thread:$0]  %s797_s3, 512, %s47_s26, [#allocation5], %s665_s12, %s665_s12, %s666_s13  }
  0x2d   :  { %s646_s0 = scalar_lea.vmem %s75_s28, 1024  ;;  %p651_p7 = scmp.lt.s32.totalorder %s75_s28, %s75_s28 }
  0x2e   :  { %p647_p6 = scmp.ne.s32.totalorder %s75_s28, %s646_s0  ;;  %p652_p8 = scmp.lt.s32.totalorder %s646_s0, %s646_s0 }
  0x30   :  { %p653_p9 = por %p652_p8, %p651_p7 }
  0x32   :  { %p654_p10 = pnand %p653_p9, %p647_p6 }
  0x34   :  { %657 = shalt.err (!%p654_p10)
}
  0x35   :  { %80 = dma.hbm_to_vmem [thread:$0]  %s801_s7, 1024, %s75_s28, [#allocation8], %s665_s12, %s665_s12, %s666_s13  }
  0x36   :  { %658 = dma.done.wait [#allocation3], 128  }
  0x37   :  { %659 = vsyncadd [#allocation3], 4294967168 }
  0x38   :  { %660 = dma.done.wait [#allocation5], 768  }
  0x39   :  { %661 = vsyncadd [#allocation5], 4294966528 }
  0x3a   :  { %662 = dma.done.wait [#allocation8], 1536  }
  0x3b   :  { %663 = vsyncadd [#allocation8], 4294965760  ;;  %v671_v0 = vmov 0.0   ;;  %vm672_vm0 = vmmov 0   ;;  %v100_v1 = vld [vmem:[#allocation4 + $0x8] sm:$0xff]  ;;  %v99_v2 = vld [vmem:[#allocation4] sm:$0xff] }
  0x3c   :  { %498 = vmatprep.subr.mxu0 %v671_v0  ;;  %502 = vmatprep.mubr.msk.f32.mxu0 %vm672_vm0, %v671_v0  ;;  %v98_v3 = vld [vmem:[#allocation2] sm:$0xff]  ;;  %vm108_vm1 = vcmask 130048   ;;  %v186_v4 = vld [vmem:[#allocation6 + $0x18] sm:$0xff]  ;;  %v185_v5 = vld [vmem:[#allocation6 + $0x10] sm:$0xff]  ;;  %vm194_vm2 = vcmask 261120   ;;  %vm369_vm3 = vcmask 523264  }
  0x3d   :  { %527 = vmatprep.subr.mxu1 %v671_v0  ;;  %543 = vmatprep.mubr.msk.f32.mxu1 %vm672_vm0, %v671_v0  ;;  %v184_v6 = vld [vmem:[#allocation6 + $0x8] sm:$0xff]  ;;  %v183_v7 = vld [vmem:[#allocation6] sm:$0xff]  ;;  %v272_v13 = vld [vmem:[#allocation7 + $0x18] sm:$0xff]  ;;  %v673_v35 = vmov 127   ;;  %vm459_vm4 = vcmask 31744  }
  0x3e   :  { %499 = vmatpush3.msra.mxu0 %v100_v1  ;;  %v468_v8 = vld [vmem:[%s796_s2] ss:$0 sm:$0xff]  ;;  %v271_v14 = vld [vmem:[#allocation7 + $0x10] sm:$0xff]  ;;  %v269_v16 = vld [vmem:[#allocation7] sm:$0xff]  ;;  %556 = vset.pattern.permute.xlu0 %v673_v35 }
  0x3f   :  { %500 = vmatprep.subr.mxu0 %v671_v0  ;;  %v270_v15 = vld [vmem:[#allocation7 + $0x8] sm:$0xff]  ;;  %v361_v17 = vld [vmem:[#allocation9 + $0x38] sm:$0xff]  ;;  %v360_v18 = vld [vmem:[#allocation9 + $0x30] sm:$0xff]  ;;  %557 = vset.pattern.permute.xlu1 %v673_v35 }
  0x40   :  { %501 = vmatpush3.msra.mxu0 %v99_v2  ;;  %528 = vmatpush3.msra.mxu1 %v361_v17  ;;  %v359_v19 = vld [vmem:[#allocation9 + $0x28] sm:$0xff]  ;;  %v358_v20 = vld [vmem:[#allocation9 + $0x20] sm:$0xff]  ;;  %v357_v21 = vld [vmem:[#allocation9 + $0x18] sm:$0xff] }
  0x41   :  { %503 = vmatmul.mubr.msk.f32.vlgmr.msra.gmra.mxu0 %vm108_vm1, %v98_v3  ;;  %505 = vmatprep.subr.mxu0 %v671_v0  ;;  %v470_v22 = vld [vmem:[%s798_s4] ss:$0 sm:$0xff]  ;;  %v356_v27 = vld [vmem:[#allocation9 + $0x10] sm:$0xff]  ;;  %v354_v29 = vld [vmem:[#allocation9] sm:$0xff] }
  0x42   :  { %506 = vmatpush3.msra.mxu0 %v186_v4  ;;  %513 = vmatprep.mubr.msk.f32.mxu0 %vm672_vm0, %v671_v0  ;;  %v355_v28 = vld [vmem:[#allocation9 + $0x8] sm:$0xff] }
  0x43   :  { %507 = vmatprep.subr.mxu0 %v671_v0  ;;  %529 = vmatprep.subr.mxu1 %v671_v0  ;;  %v472_v30 = vld [vmem:[%s800_s6] ss:$0 sm:$0xff] }
  0x44   :  { %508 = vmatpush3.msra.mxu0 %v185_v5  ;;  %530 = vmatpush3.msra.mxu1 %v360_v18  ;;  %v474_v36 = vld [vmem:[%s802_s8] ss:$0 sm:$0xff] }
  0x45   :  { %509 = vmatprep.subr.mxu0 %v671_v0  ;;  %531 = vmatprep.subr.mxu1 %v671_v0 }
  0x46   :  { %510 = vmatpush3.msra.mxu0 %v184_v6  ;;  %532 = vmatpush3.msra.mxu1 %v359_v19 }
  0x47   :  { %511 = vmatprep.subr.mxu0 %v671_v0  ;;  %533 = vmatprep.subr.mxu1 %v671_v0 }
  0x48   :  { %512 = vmatpush3.msra.mxu0 %v183_v7  ;;  %534 = vmatpush3.msra.mxu1 %v358_v20 }
  0x49   :  { %516 = vmatprep.subr.mxu0 %v671_v0  ;;  %535 = vmatprep.subr.mxu1 %v671_v0 }
  0x4a   :  { %536 = vmatpush3.msra.mxu1 %v357_v21 }
  0x4b   :  { %537 = vmatprep.subr.mxu1 %v671_v0 }
  0x4c   :  { %538 = vmatpush3.msra.mxu1 %v356_v27 }
  0x4d   :  { %539 = vmatprep.subr.mxu1 %v671_v0 }
  0x4e   :  { %540 = vmatpush3.msra.mxu1 %v355_v28 }
  0x4f   :  { %541 = vmatprep.subr.mxu1 %v671_v0 }
  0x50   :  { %542 = vmatpush3.msra.mxu1 %v354_v29 }
 0x101   :  { %v178_v9 = vpop.f32.mrf.mxu0 }
 0x102   :  { %v179_v10 = vadd.f32 %v468_v8, %v178_v9 }
 0x103   :  { %v504_v11 = vpop.f32.mrf.mxu0 }
 0x104   :  { %v182_v12 = vmax.f32 %v179_v10, 0.0 }
 0x106   :  { %514 = vmatmul.mubr.msk.f32.vlgmr.msra.gmra.mxu0 %vm194_vm2, %v182_v12 }
 0x107   :  { %517 = vmatpush3.msra.mxu0 %v272_v13  ;;  %524 = vmatprep.mubr.msk.f32.mxu0 %vm672_vm0, %v671_v0 }
 0x108   :  { %518 = vmatprep.subr.mxu0 %v671_v0 }
 0x109   :  { %519 = vmatpush3.msra.mxu0 %v271_v14 }
 0x10a   :  { %520 = vmatprep.subr.mxu0 %v671_v0 }
 0x10b   :  { %521 = vmatpush3.msra.mxu0 %v270_v15 }
 0x10c   :  { %522 = vmatprep.subr.mxu0 %v671_v0 }
 0x10d   :  { %523 = vmatpush3.msra.mxu0 %v269_v16 }
 0x1c6   :  { %v264_v23 = vpop.f32.mrf.mxu0 }
 0x1c7   :  { %v265_v24 = vadd.f32 %v470_v22, %v264_v23 }
 0x1c8   :  { %v515_v25 = vpop.f32.mrf.mxu0 }
 0x1c9   :  { %v268_v26 = vmax.f32 %v265_v24, 0.0 }
 0x1cb   :  { %525 = vmatmul.mubr.msk.f32.vlgmr.msra.gmra.mxu0 %vm194_vm2, %v268_v26 }
 0x28b   :  { %v349_v31 = vpop.f32.mrf.mxu0 }
 0x28c   :  { %v350_v32 = vadd.f32 %v472_v30, %v349_v31 }
 0x28d   :  { %v526_v33 = vpop.f32.mrf.mxu0 }
 0x28e   :  { %v353_v34 = vmax.f32 %v350_v32, 0.0 }
 0x290   :  { %544 = vmatmul.mubr.msk.f32.vlgmr.msra.gmra.mxu1 %vm369_vm3, %v353_v34 }
 0x350   :  { %v439_v37 = vpop.f32.mrf.mxu1 }
 0x351   :  { %v440_v38 = vadd.f32 %v474_v36, %v439_v37 }
 0x352   :  { %v545_v39 = vpop.f32.mrf.mxu1 }
 0x353   :  { %443 = vadd.xlane.f32.xlu0 %v440_v38 }
 0x369   :  { %449 = vperm.xlu0 %556, %v440_v38  }
 0x3dc   :  { %v444_v40 = vpop.xlane.xlu0 %443 }
 0x3dd   :  { %v445_v41 = vsub.f32 %v444_v40, %v440_v38 }
 0x3df   :  { %v446_v42 = vmul.f32 0.25, %v445_v41 }
 0x3e1   :  { %455 = vperm.xlu1 %557, %v446_v42  }
 0x3e4   :  { %v450_v43 = vpop.permute.xlu0 %449 }
 0x3e5   :  { %v452_v44 = vadd.f32 %v450_v43, %v440_v38 }
 0x45c   :  { %v456_v45 = vpop.permute.xlu1 %455 }
 0x45d   :  { %v458_v46 = vsub.f32 %v452_v44, %v456_v45 }
 0x45f   :  { %460 = vst.msk [vmem:[%s803_s9] sm:$0xff] %vm459_vm4, %v458_v46 }
 0x460   :  { %465 = vsyncpa [#allocation3], 1 }
 0x461   :  { %466 = vsyncpa [#allocation5], 1 }
 0x462   :  { %467 = vsyncpa [#allocation8], 1 }

// kernel: tpu_custom_call.1
= control target key start
LH: loop header
LB: loop body
LE: loop exit
PB: predicated region body
PF: predicated region fallthrough
CT: control target
= control target key end

     0   :  { %14 = vsyncpa [#allocation3], 0  ;;  %s794_s0 = inlined_call_operand.hbm [shape: f32[8,16], index: 0, kind: input, shape index: {}]   ;;  %s795_s1 = inlined_call_operand.hbm [shape: f32[16,32], index: 1, kind: input, shape index: {}]   ;;  %s796_s2 = inlined_call_operand.vmem [shape: f32[1,32], index: 2, kind: input, shape index: {}]   ;;  %s797_s3 = inlined_call_operand.hbm [shape: f32[32,32], index: 3, kind: input, shape index: {}]   ;;  %s798_s4 = inlined_call_operand.vmem [shape: f32[1,32], index: 4, kind: input, shape index: {}]   ;;  %s799_s5 = inlined_call_operand.hbm [shape: f32[32,64], index: 5, kind: input, shape index: {}]   ;;  %s800_s6 = inlined_call_operand.vmem [shape: f32[1,64], index: 6, kind: input, shape index: {}]   ;;  %s801_s7 = inlined_call_operand.hbm [shape: f32[64,128], index: 7, kind: input, shape index: {}]   ;;  %s802_s8 = inlined_call_operand.vmem [shape: f32[1,128], index: 8, kind: input, shape index: {}]   ;;  %s803_s9 = inlined_call_operand.vmem [shape: f32[8,4], index: 9, kind: output, shape index: {}]  }
   0x1   :  { %15 = vsyncpa [#allocation5], 0 }
   0x2   :  { %16 = vsyncpa [#allocation8], 0  ;;  %s664_s30 = smov [#allocation4]  }
   0x3   :  { %s32_s10 = sshll.u32 %s664_s30, 4  ;;  %s33_s10 = int_to_ptr.vmem [resolvable:$true] %s32_s10 }
   0x4   :  { %s566_s11 = scalar_lea.vmem %s33_s10, 256  ;;  %p571_p1 = scmp.lt.s32.totalorder %s33_s10, %s33_s10 }
   0x5   :  { %p567_p0 = scmp.ne.s32.totalorder %s33_s10, %s566_s11  ;;  %p572_p2 = scmp.lt.s32.totalorder %s566_s11, %s566_s11 }
   0x7   :  { %p573_p3 = por %p572_p2, %p571_p1 }
   0x9   :  { %p574_p4 = pnand %p573_p3, %p567_p0 }
   0xb   :  { %577 = shalt.err (!%p574_p4)
}
   0xc   :  { %s665_s12 = smov 128   ;;  %s666_s13 = smov 8  }
   0xd   :  { %38 = dma.hbm_to_vmem [thread:$0]  %s795_s1, 256, %s33_s10, [#allocation5], %s665_s12, %s665_s12, %s666_s13  }
   0xe   :  { %s667_s16 = smov [#allocation7]   ;;  %s668_s18 = smov [#allocation2]  }
   0xf   :  { %s60_s17 = sshll.u32 %s667_s16, 4  ;;  %s23_s19 = sshll.u32 %s668_s18, 4  ;;  %s61_s17 = int_to_ptr.vmem [resolvable:$true] %s60_s17  ;;  %s24_s19 = int_to_ptr.vmem [resolvable:$true] %s23_s19 }
  0x10   :  { %s586_s20 = scalar_lea.vmem %s61_s17, 512  ;;  %p591_p6 = scmp.lt.s32.totalorder %s61_s17, %s61_s17 }
  0x11   :  { %p587_p5 = scmp.ne.s32.totalorder %s61_s17, %s586_s20  ;;  %p592_p7 = scmp.lt.s32.totalorder %s586_s20, %s586_s20 }
  0x13   :  { %p593_p8 = por %p592_p7, %p591_p6 }
  0x15   :  { %p594_p9 = pnand %p593_p8, %p587_p5 }
  0x17   :  { %597 = shalt.err (!%p594_p9)
}
  0x18   :  { %66 = dma.hbm_to_vmem [thread:$0]  %s799_s5, 512, %s61_s17, [#allocation8], %s665_s12, %s665_s12, %s666_s13  }
  0x19   :  { %s606_s1 = scalar_lea.vmem %s24_s19, 128  ;;  %p611_p11 = scmp.lt.s32.totalorder %s24_s19, %s24_s19 }
  0x1a   :  { %p607_p10 = scmp.ne.s32.totalorder %s24_s19, %s606_s1  ;;  %p612_p12 = scmp.lt.s32.totalorder %s606_s1, %s606_s1 }
  0x1c   :  { %p613_p13 = por %p612_p12, %p611_p11 }
  0x1e   :  { %p614_p0 = pnand %p613_p13, %p607_p10 }
  0x20   :  { %617 = shalt.err (!%p614_p0)
}
  0x21   :  { %26 = dma.hbm_to_vmem [thread:$0]  %s794_s0, 128, %s24_s19, [#allocation3]  }
  0x22   :  { %s669_s25 = smov [#allocation6]   ;;  %s670_s27 = smov [#allocation9]  }
  0x23   :  { %s46_s26 = sshll.u32 %s669_s25, 4  ;;  %s74_s28 = sshll.u32 %s670_s27, 4  ;;  %s47_s26 = int_to_ptr.vmem [resolvable:$true] %s46_s26  ;;  %s75_s28 = int_to_ptr.vmem [resolvable:$true] %s74_s28 }
  0x24   :  { %s626_s29 = scalar_lea.vmem %s47_s26, 512  ;;  %p631_p2 = scmp.lt.s32.totalorder %s47_s26, %s47_s26 }
  0x25   :  { %p627_p1 = scmp.ne.s32.totalorder %s47_s26, %s626_s29  ;;  %p632_p3 = scmp.lt.s32.totalorder %s626_s29, %s626_s29 }
  0x27   :  { %p633_p4 = por %p632_p3, %p631_p2 }
  0x29   :  { %p634_p5 = pnand %p633_p4, %p627_p1 }
  0x2b   :  { %637 = shalt.err (!%p634_p5)
}
  0x2c   :  { %52 = dma.hbm_to_vmem [thread:$0]  %s797_s3, 512, %s47_s26, [#allocation5], %s665_s12, %s665_s12, %s666_s13  }
  0x2d   :  { %s646_s0 = scalar_lea.vmem %s75_s28, 1024  ;;  %p651_p7 = scmp.lt.s32.totalorder %s75_s28, %s75_s28 }
  0x2e   :  { %p647_p6 = scmp.ne.s32.totalorder %s75_s28, %s646_s0  ;;  %p652_p8 = scmp.lt.s32.totalorder %s646_s0, %s646_s0 }
  0x30   :  { %p653_p9 = por %p652_p8, %p651_p7 }
  0x32   :  { %p654_p10 = pnand %p653_p9, %p647_p6 }
  0x34   :  { %657 = shalt.err (!%p654_p10)
}
  0x35   :  { %80 = dma.hbm_to_vmem [thread:$0]  %s801_s7, 1024, %s75_s28, [#allocation8], %s665_s12, %s665_s12, %s666_s13  }
  0x36   :  { %658 = dma.done.wait [#allocation3], 128  }
  0x37   :  { %659 = vsyncadd [#allocation3], 4294967168 }
  0x38   :  { %660 = dma.done.wait [#allocation5], 768  }
  0x39   :  { %661 = vsyncadd [#allocation5], 4294966528 }
  0x3a   :  { %662 = dma.done.wait [#allocation8], 1536  }
  0x3b   :  { %663 = vsyncadd [#allocation8], 4294965760  ;;  %v671_v0 = vmov 0.0   ;;  %vm672_vm0 = vmmov 0   ;;  %v100_v1 = vld [vmem:[#allocation4 + $0x8] sm:$0xff]  ;;  %v99_v2 = vld [vmem:[#allocation4] sm:$0xff] }
  0x3c   :  { %498 = vmatprep.subr.mxu0 %v671_v0  ;;  %502 = vmatprep.mubr.msk.f32.mxu0 %vm672_vm0, %v671_v0  ;;  %v98_v3 = vld [vmem:[#allocation2] sm:$0xff]  ;;  %vm108_vm1 = vcmask 130048   ;;  %v186_v4 = vld [vmem:[#allocation6 + $0x18] sm:$0xff]  ;;  %v185_v5 = vld [vmem:[#allocation6 + $0x10] sm:$0xff]  ;;  %vm194_vm2 = vcmask 261120   ;;  %vm369_vm3 = vcmask 523264  }
  0x3d   :  { %527 = vmatprep.subr.mxu1 %v671_v0  ;;  %543 = vmatprep.mubr.msk.f32.mxu1 %vm672_vm0, %v671_v0  ;;  %v184_v6 = vld [vmem:[#allocation6 + $0x8] sm:$0xff]  ;;  %v183_v7 = vld [vmem:[#allocation6] sm:$0xff]  ;;  %v272_v13 = vld [vmem:[#allocation7 + $0x18] sm:$0xff]  ;;  %v673_v35 = vmov 127   ;;  %vm459_vm4 = vcmask 31744  }
  0x3e   :  { %499 = vmatpush3.msra.mxu0 %v100_v1  ;;  %v468_v8 = vld [vmem:[%s796_s2] ss:$0 sm:$0xff]  ;;  %v271_v14 = vld [vmem:[#allocation7 + $0x10] sm:$0xff]  ;;  %v269_v16 = vld [vmem:[#allocation7] sm:$0xff]  ;;  %556 = vset.pattern.permute.xlu0 %v673_v35 }
  0x3f   :  { %500 = vmatprep.subr.mxu0 %v671_v0  ;;  %v270_v15 = vld [vmem:[#allocation7 + $0x8] sm:$0xff]  ;;  %v361_v17 = vld [vmem:[#allocation9 + $0x38] sm:$0xff]  ;;  %v360_v18 = vld [vmem:[#allocation9 + $0x30] sm:$0xff]  ;;  %557 = vset.pattern.permute.xlu1 %v673_v35 }
  0x40   :  { %501 = vmatpush3.msra.mxu0 %v99_v2  ;;  %528 = vmatpush3.msra.mxu1 %v361_v17  ;;  %v359_v19 = vld [vmem:[#allocation9 + $0x28] sm:$0xff]  ;;  %v358_v20 = vld [vmem:[#allocation9 + $0x20] sm:$0xff]  ;;  %v357_v21 = vld [vmem:[#allocation9 + $0x18] sm:$0xff] }
  0x41   :  { %503 = vmatmul.mubr.msk.f32.vlgmr.msra.gmra.mxu0 %vm108_vm1, %v98_v3  ;;  %505 = vmatprep.subr.mxu0 %v671_v0  ;;  %v470_v22 = vld [vmem:[%s798_s4] ss:$0 sm:$0xff]  ;;  %v356_v27 = vld [vmem:[#allocation9 + $0x10] sm:$0xff]  ;;  %v354_v29 = vld [vmem:[#allocation9] sm:$0xff] }
  0x42   :  { %506 = vmatpush3.msra.mxu0 %v186_v4  ;;  %513 = vmatprep.mubr.msk.f32.mxu0 %vm672_vm0, %v671_v0  ;;  %v355_v28 = vld [vmem:[#allocation9 + $0x8] sm:$0xff] }
  0x43   :  { %507 = vmatprep.subr.mxu0 %v671_v0  ;;  %529 = vmatprep.subr.mxu1 %v671_v0  ;;  %v472_v30 = vld [vmem:[%s800_s6] ss:$0 sm:$0xff] }
  0x44   :  { %508 = vmatpush3.msra.mxu0 %v185_v5  ;;  %530 = vmatpush3.msra.mxu1 %v360_v18  ;;  %v474_v36 = vld [vmem:[%s802_s8] ss:$0 sm:$0xff] }
  0x45   :  { %509 = vmatprep.subr.mxu0 %v671_v0  ;;  %531 = vmatprep.subr.mxu1 %v671_v0 }
  0x46   :  { %510 = vmatpush3.msra.mxu0 %v184_v6  ;;  %532 = vmatpush3.msra.mxu1 %v359_v19 }
  0x47   :  { %511 = vmatprep.subr.mxu0 %v671_v0  ;;  %533 = vmatprep.subr.mxu1 %v671_v0 }
  0x48   :  { %512 = vmatpush3.msra.mxu0 %v183_v7  ;;  %534 = vmatpush3.msra.mxu1 %v358_v20 }
  0x49   :  { %516 = vmatprep.subr.mxu0 %v671_v0  ;;  %535 = vmatprep.subr.mxu1 %v671_v0 }
  0x4a   :  { %536 = vmatpush3.msra.mxu1 %v357_v21 }
  0x4b   :  { %537 = vmatprep.subr.mxu1 %v671_v0 }
  0x4c   :  { %538 = vmatpush3.msra.mxu1 %v356_v27 }
  0x4d   :  { %539 = vmatprep.subr.mxu1 %v671_v0 }
  0x4e   :  { %540 = vmatpush3.msra.mxu1 %v355_v28 }
  0x4f   :  { %541 = vmatprep.subr.mxu1 %v671_v0 }
  0x50   :  { %542 = vmatpush3.msra.mxu1 %v354_v29 }
 0x101   :  { %v178_v9 = vpop.f32.mrf.mxu0 }
 0x102   :  { %v179_v10 = vadd.f32 %v468_v8, %v178_v9 }
 0x103   :  { %v504_v11 = vpop.f32.mrf.mxu0 }
 0x104   :  { %v182_v12 = vmax.f32 %v179_v10, 0.0 }
 0x106   :  { %514 = vmatmul.mubr.msk.f32.vlgmr.msra.gmra.mxu0 %vm194_vm2, %v182_v12 }
 0x107   :  { %517 = vmatpush3.msra.mxu0 %v272_v13  ;;  %524 = vmatprep.mubr.msk.f32.mxu0 %vm672_vm0, %v671_v0 }
 0x108   :  { %518 = vmatprep.subr.mxu0 %v671_v0 }
 0x109   :  { %519 = vmatpush3.msra.mxu0 %v271_v14 }
 0x10a   :  { %520 = vmatprep.subr.mxu0 %v671_v0 }
 0x10b   :  { %521 = vmatpush3.msra.mxu0 %v270_v15 }
 0x10c   :  { %522 = vmatprep.subr.mxu0 %v671_v0 }
 0x10d   :  { %523 = vmatpush3.msra.mxu0 %v269_v16 }
 0x1c6   :  { %v264_v23 = vpop.f32.mrf.mxu0 }
 0x1c7   :  { %v265_v24 = vadd.f32 %v470_v22, %v264_v23 }
 0x1c8   :  { %v515_v25 = vpop.f32.mrf.mxu0 }
 0x1c9   :  { %v268_v26 = vmax.f32 %v265_v24, 0.0 }
 0x1cb   :  { %525 = vmatmul.mubr.msk.f32.vlgmr.msra.gmra.mxu0 %vm194_vm2, %v268_v26 }
 0x28b   :  { %v349_v31 = vpop.f32.mrf.mxu0 }
 0x28c   :  { %v350_v32 = vadd.f32 %v472_v30, %v349_v31 }
 0x28d   :  { %v526_v33 = vpop.f32.mrf.mxu0 }
 0x28e   :  { %v353_v34 = vmax.f32 %v350_v32, 0.0 }
 0x290   :  { %544 = vmatmul.mubr.msk.f32.vlgmr.msra.gmra.mxu1 %vm369_vm3, %v353_v34 }
 0x350   :  { %v439_v37 = vpop.f32.mrf.mxu1 }
 0x351   :  { %v440_v38 = vadd.f32 %v474_v36, %v439_v37 }
 0x352   :  { %v545_v39 = vpop.f32.mrf.mxu1 }
 0x353   :  { %443 = vadd.xlane.f32.xlu0 %v440_v38 }
 0x369   :  { %449 = vperm.xlu0 %556, %v440_v38  }
 0x3dc   :  { %v444_v40 = vpop.xlane.xlu0 %443 }
 0x3dd   :  { %v445_v41 = vsub.f32 %v444_v40, %v440_v38 }
 0x3df   :  { %v446_v42 = vmul.f32 0.25, %v445_v41 }
 0x3e1   :  { %455 = vperm.xlu1 %557, %v446_v42  }
 0x3e4   :  { %v450_v43 = vpop.permute.xlu0 %449 }
 0x3e5   :  { %v452_v44 = vadd.f32 %v450_v43, %v440_v38 }
 0x45c   :  { %v456_v45 = vpop.permute.xlu1 %455 }
 0x45d   :  { %v458_v46 = vsub.f32 %v452_v44, %v456_v45 }
 0x45f   :  { %460 = vst.msk [vmem:[%s803_s9] sm:$0xff] %vm459_vm4, %v458_v46 }
 0x460   :  { %465 = vsyncpa [#allocation3], 1 }
 0x461   :  { %466 = vsyncpa [#allocation5], 1 }
 0x462   :  { %467 = vsyncpa [#allocation8], 1 }

</bundles_post_ra>
